<compile_context>
chip_gen: v6e
topology: v6e:2x2x1
jax: 0.10.0
libtpu: 0.0.40
codegen_flags: <defaults>
</compile_context>

<pallas_src>
import math
import functools

import jax
import jax.numpy as jnp
from jax.experimental import pallas as pl
from jax.experimental.pallas import tpu as pltpu


def _mha_kernel(*refs, eps, has_mask, compute_dtype):
    # Ref order mirrors the in_specs order in the wrapper, then out_ref, scratch.
    if has_mask:
        (q_ref, k_ref, v_ref, mask_ref,
         wqh_ref, wkh_ref, wvh_ref, woh_ref,
         bqh_ref, bkh_ref, bvh_ref,
         wq_ref, bq_ref, bo_ref, gamma_ref, beta_ref,
         out_ref, acc_ref) = refs
    else:
        (q_ref, k_ref, v_ref,
         wqh_ref, wkh_ref, wvh_ref, woh_ref,
         bqh_ref, bkh_ref, bvh_ref,
         wq_ref, bq_ref, bo_ref, gamma_ref, beta_ref,
         out_ref, acc_ref) = refs
        mask_ref = None

    h = pl.program_id(2)                       # head index (innermost, "arbitrary")

    xq = q_ref[0].astype(compute_dtype)        # (TQ, D)
    xk = k_ref[0].astype(compute_dtype)        # (S,  D)
    xv = v_ref[0].astype(compute_dtype)        # (S,  D)

    # ---- init accumulator: residual (projected, unscaled query) + output bias ----
    @pl.when(h == 0)
    def _init():
        q_full = jnp.dot(xq, wq_ref[...], preferred_element_type=jnp.float32)  # (TQ, D)
        acc_ref[...] = q_full + bq_ref[0] + bo_ref[0]

    # ---- per-head projections (1/sqrt(dk) already folded into wqh/bqh) ----
    Qh = jnp.dot(xq, wqh_ref[0], preferred_element_type=jnp.float32) + bqh_ref[0]  # (TQ, dk)
    Kh = jnp.dot(xk, wkh_ref[0], preferred_element_type=jnp.float32) + bkh_ref[0]  # (S,  dk)
    Vh = jnp.dot(xv, wvh_ref[0], preferred_element_type=jnp.float32) + bvh_ref[0]  # (S,  dk)

    scores = jnp.einsum("qd,kd->qk",
                        Qh.astype(compute_dtype), Kh.astype(compute_dtype),
                        preferred_element_type=jnp.float32)                        # (TQ, S)

    if has_mask:
        keep = mask_ref[0] != 0                # int8 mask, 0 == masked
        scores = jnp.where(keep, scores, jnp.float32(-1e9))

    # Numerically-stable softmax (f32); reciprocal on the EUP slot.
    mx = jnp.max(scores, axis=-1, keepdims=True)
    e = jnp.exp(scores - mx)
    p = e * pl.reciprocal(jnp.sum(e, axis=-1, keepdims=True), approx=True)

    ctx = jnp.dot(p.astype(compute_dtype), Vh.astype(compute_dtype),
                  preferred_element_type=jnp.float32)                              # (TQ, dk)

    # concat_h(ctx) @ Wo == sum_h ctx_h @ Wo_h  -> accumulate per head.
    acc_ref[...] += jnp.dot(ctx.astype(compute_dtype), woh_ref[0],
                            preferred_element_type=jnp.float32)                    # (TQ, D)

    # ---- finalize: LayerNorm(O + Q) and write the output tile once ----
    @pl.when(h == pl.num_programs(2) - 1)
    def _finalize():
        res = acc_ref[...]
        mean = jnp.mean(res, axis=-1, keepdims=True)
        cent = res - mean
        var = jnp.mean(cent * cent, axis=-1, keepdims=True)
        y = cent * jax.lax.rsqrt(var + eps) * gamma_ref[0] + beta_ref[0]
        out_ref[0] = y.astype(out_ref.dtype)


def multi_head_attention(q, k, v, params, mask=None, *, n_heads,
                         eps=1e-5, compute_dtype=jnp.bfloat16, q_block=None):
    """q, k, v: (B, S, D) float32.  mask: optional (B, S, S) or (B, 1, S, S),
    0 == masked.  params: (Wq, bq, Wk, bk, Wv, bv, Wo, bo, gamma, beta) with
    weights stored (in_features, out_features) so x @ W + b == PyTorch Linear."""
    B, S, D = q.shape
    assert D % n_heads == 0
    H = n_heads
    dk = D // H
    cd = jnp.dtype(compute_dtype)

    wq, bq, wk, bk, wv, bv, wo, bo, gamma, beta = params

    # Query tile: prefer 256 (v6e/v7x MXU width), then 128; fall back to full S.
    if q_block is None:
        if S % 256 == 0:
            TQ = 256
        elif S % 128 == 0:
            TQ = 128
        else:
            TQ = S
    else:
        TQ = q_block
    assert S % TQ == 0 and (TQ == S or TQ % 8 == 0)
    nq = S // TQ

    scale = 1.0 / math.sqrt(dk)

    # Head-major weight layouts (plain XLA, done once outside the kernel).
    def _heads_in(w):                     # (D, D) -> (H, D, dk), columns per head
        return jnp.transpose(w.reshape(D, H, dk), (1, 0, 2))

    wqh = _heads_in(wq * scale).astype(cd)          # scale folded into Q path only
    wkh = _heads_in(wk).astype(cd)
    wvh = _heads_in(wv).astype(cd)
    woh = wo.reshape(H, dk, D).astype(cd)           # rows per head
    bqh = (bq * scale).reshape(H, 1, dk).astype(jnp.float32)
    bkh = bk.reshape(H, 1, dk).astype(jnp.float32)
    bvh = bv.reshape(H, 1, dk).astype(jnp.float32)

    wq_full = wq.astype(cd)                         # unscaled, for the residual Q
    bq_r = bq.reshape(1, D).astype(jnp.float32)
    bo_r = bo.reshape(1, D).astype(jnp.float32)
    g_r = gamma.reshape(1, D).astype(jnp.float32)
    b_r = beta.reshape(1, D).astype(jnp.float32)

    has_mask = mask is not None

    args = [q, k, v]
    in_specs = [
        pl.BlockSpec((1, TQ, D), lambda b, qi, h: (b, qi, 0)),   # q (per q-tile)
        pl.BlockSpec((1, S, D), lambda b, qi, h: (b, 0, 0)),     # k (full seq)
        pl.BlockSpec((1, S, D), lambda b, qi, h: (b, 0, 0)),     # v (full seq)
    ]
    if has_mask:
        m_i8 = (mask.reshape(B, S, S) != 0).astype(jnp.int8)
        args.append(m_i8)
        in_specs.append(pl.BlockSpec((1, TQ, S), lambda b, qi, h: (b, qi, 0)))

    args += [wqh, wkh, wvh, woh, bqh, bkh, bvh, wq_full, bq_r, bo_r, g_r, b_r]
    # NOTE: these weight/bias blocks have constant-or-head-only index maps; at
    # large D they could additionally be single-buffered / staged once in VMEM.
    in_specs += [
        pl.BlockSpec((1, D, dk), lambda b, qi, h: (h, 0, 0)),    # Wq per head
        pl.BlockSpec((1, D, dk), lambda b, qi, h: (h, 0, 0)),    # Wk per head
        pl.BlockSpec((1, D, dk), lambda b, qi, h: (h, 0, 0)),    # Wv per head
        pl.BlockSpec((1, dk, D), lambda b, qi, h: (h, 0, 0)),    # Wo per head
        pl.BlockSpec((1, 1, dk), lambda b, qi, h: (h, 0, 0)),    # bq per head
        pl.BlockSpec((1, 1, dk), lambda b, qi, h: (h, 0, 0)),    # bk per head
        pl.BlockSpec((1, 1, dk), lambda b, qi, h: (h, 0, 0)),    # bv per head
        pl.BlockSpec((D, D), lambda b, qi, h: (0, 0)),           # full Wq (residual)
        pl.BlockSpec((1, D), lambda b, qi, h: (0, 0)),           # full bq
        pl.BlockSpec((1, D), lambda b, qi, h: (0, 0)),           # bo
        pl.BlockSpec((1, D), lambda b, qi, h: (0, 0)),           # LN gamma
        pl.BlockSpec((1, D), lambda b, qi, h: (0, 0)),           # LN beta
    ]

    # Advisory cost estimate for the XLA scheduler.
    flops = 2 * B * S * D * D                 # per-head Q projection (all heads)
    flops += 2 * B * S * D * D                # residual full-Q projection
    flops += 2 * B * nq * S * D * D * 2       # K and V projections (per q-tile)
    flops += 2 * B * S * S * D * 2            # scores + probs @ V (all heads)
    flops += 2 * B * S * D * D                # per-head output projection
    transcendentals = B * H * S * S           # exp
    bytes_accessed = (4 * B * S * D * 4                      # q, k, v in + out
                      + cd.itemsize * 5 * D * D              # weights
                      + 4 * (3 * H * dk + 4 * D)             # biases + LN params
                      + (B * S * S if has_mask else 0))      # int8 mask

    kernel = functools.partial(_mha_kernel, eps=eps, has_mask=has_mask,
                               compute_dtype=cd)

    return pl.pallas_call(
        kernel,
        out_shape=jax.ShapeDtypeStruct((B, S, D), q.dtype),
        grid_spec=pltpu.PrefetchScalarGridSpec(
            num_scalar_prefetch=0,
            grid=(B, nq, H),
            in_specs=in_specs,
            out_specs=pl.BlockSpec((1, TQ, D), lambda b, qi, h: (b, qi, 0)),
            scratch_shapes=[pltpu.VMEM((TQ, D), jnp.float32)],
        ),
        compiler_params=pltpu.CompilerParams(
            dimension_semantics=("parallel", "parallel", "arbitrary"),
            vmem_limit_bytes=48 * 1024 * 1024,
        ),
        cost_estimate=pl.CostEstimate(flops=int(flops),
                                      transcendentals=int(transcendentals),
                                      bytes_accessed=int(bytes_accessed)),
    )(*args)


def _reference(q, k, v, params, n_heads, mask=None, eps=1e-5):
    """Pure-JAX f32 reference mirroring the PyTorch forward (eval-mode dropout)."""
    wq, bq, wk, bk, wv, bv, wo, bo, gamma, beta = params
    B, S, D = q.shape
    d_k = D // n_heads
    Q = q @ wq + bq
    K = k @ wk + bk
    V = v @ wv + bv
    Qh = Q.reshape(B, S, n_heads, d_k).transpose(0, 2, 1, 3)
    Kh = K.reshape(B, S, n_heads, d_k).transpose(0, 2, 1, 3)
    Vh = V.reshape(B, S, n_heads, d_k).transpose(0, 2, 1, 3)
    scores = jnp.einsum("bhqd,bhkd->bhqk", Qh, Kh) / math.sqrt(d_k)
    if mask is not None:
        scores = jnp.where(mask[:, None, :, :] == 0, -1e9, scores)
    p = jax.nn.softmax(scores, axis=-1)
    ctx = jnp.einsum("bhqk,bhkd->bhqd", p, Vh)
    attn = ctx.transpose(0, 2, 1, 3).reshape(B, S, D)
    O = attn @ wo + bo
    res = O + Q
    mean = res.mean(-1, keepdims=True)
    var = ((res - mean) ** 2).mean(-1, keepdims=True)
    return (res - mean) / jnp.sqrt(var + eps) * gamma + beta


if __name__ == "__main__":
    B, S, D, H = 2, 8, 32, 4     # batch, seq_len, d_model, n_heads (d_k = 8)
    key = jax.random.PRNGKey(0)
    keys = jax.random.split(key, 16)

    init = 1.0 / math.sqrt(D)
    # Deterministic synthetic parameters (nn.Linear-like init; weights stored (in, out)).
    wq = jax.random.uniform(keys[0], (D, D), jnp.float32, -init, init)
    bq = jax.random.uniform(keys[1], (D,), jnp.float32, -init, init)
    wk = jax.random.uniform(keys[2], (D, D), jnp.float32, -init, init)
    bk = jax.random.uniform(keys[3], (D,), jnp.float32, -init, init)
    wv = jax.random.uniform(keys[4], (D, D), jnp.float32, -init, init)
    bv = jax.random.uniform(keys[5], (D,), jnp.float32, -init, init)
    wo = jax.random.uniform(keys[6], (D, D), jnp.float32, -init, init)
    bo = jax.random.uniform(keys[7], (D,), jnp.float32, -init, init)
    gamma = jnp.ones((D,), jnp.float32)
    beta = jnp.zeros((D,), jnp.float32)
    params = (wq, bq, wk, bk, wv, bv, wo, bo, gamma, beta)

    q = jax.random.normal(keys[8], (B, S, D), jnp.float32)
    k = jax.random.normal(keys[9], (B, S, D), jnp.float32)
    v = jax.random.normal(keys[10], (B, S, D), jnp.float32)

    tol = dict(atol=2e-2, rtol=2e-2)   # bf16 matmul operands vs f32 reference

    # 1) no mask (compiles the mask-free variant: no mask DMA, no select)
    out = multi_head_attention(q, k, v, params, mask=None, n_heads=H)
    out = jax.block_until_ready(out)
    ref = _reference(q, k, v, params, n_heads=H)
    assert out.shape == (B, S, D)
    assert jnp.allclose(out, ref, **tol), "mismatch vs reference (no mask)"

    # 2) causal mask (int8 mask path)
    mask = jnp.broadcast_to(jnp.tril(jnp.ones((S, S), jnp.int32)), (B, S, S))
    out_m = multi_head_attention(q, k, v, params, mask=mask, n_heads=H)
    out_m = jax.block_until_ready(out_m)
    ref_m = _reference(q, k, v, params, n_heads=H, mask=mask)
    assert jnp.allclose(out_m, ref_m, **tol), "mismatch vs reference (masked)"

    # 3) q-tiled path (two query tiles per batch element) with mask
    S2 = 16
    q2 = jax.random.normal(keys[11], (B, S2, D), jnp.float32)
    k2 = jax.random.normal(keys[12], (B, S2, D), jnp.float32)
    v2 = jax.random.normal(keys[13], (B, S2, D), jnp.float32)
    mask2 = jnp.broadcast_to(jnp.tril(jnp.ones((S2, S2), jnp.int32)), (B, S2, S2))
    out2 = multi_head_attention(q2, k2, v2, params, mask=mask2, n_heads=H, q_block=8)
    out2 = jax.block_until_ready(out2)
    ref2 = _reference(q2, k2, v2, params, n_heads=H, mask=mask2)
    assert jnp.allclose(out2, ref2, **tol), "mismatch vs reference (q-tiled)"

    print("KERNEL_OK")
</pallas_src>

<mosaic_0001>
module attributes {stable_mosaic.version = 11 : i64} {
  func.func @_mha_kernel(%arg0: i32, %arg1: i32, %arg2: i32, %arg3: memref<1x8x32xf32, #tpu.memory_space<vmem>>, %arg4: memref<1x8x32xf32, #tpu.memory_space<vmem>>, %arg5: memref<1x8x32xf32, #tpu.memory_space<vmem>>, %arg6: memref<1x32x8xbf16, #tpu.memory_space<vmem>>, %arg7: memref<1x32x8xbf16, #tpu.memory_space<vmem>>, %arg8: memref<1x32x8xbf16, #tpu.memory_space<vmem>>, %arg9: memref<1x8x32xbf16, #tpu.memory_space<vmem>>, %arg10: memref<1x1x8xf32, #tpu.memory_space<vmem>>, %arg11: memref<1x1x8xf32, #tpu.memory_space<vmem>>, %arg12: memref<1x1x8xf32, #tpu.memory_space<vmem>>, %arg13: memref<32x32xbf16, #tpu.memory_space<vmem>>, %arg14: memref<1x32xf32, #tpu.memory_space<vmem>>, %arg15: memref<1x32xf32, #tpu.memory_space<vmem>>, %arg16: memref<1x32xf32, #tpu.memory_space<vmem>>, %arg17: memref<1x32xf32, #tpu.memory_space<vmem>>, %arg18: memref<1x8x32xf32, #tpu.memory_space<vmem>>, %arg19: memref<8x32xf32, #tpu.memory_space<vmem>>) attributes {dimension_semantics = [#tpu.dimension_semantics<parallel>, #tpu.dimension_semantics<parallel>, #tpu.dimension_semantics<arbitrary>], iteration_bounds = array<i64: 2, 1, 4>, scalar_prefetch = 0 : i64, scratch_operands = 1 : i64, tpu.core_type = #tpu.core_type<tc>, window_params = [{transform_indices = @transform_0, window_bounds = array<i64: 1, 8, 32>}, {transform_indices = @transform_1, window_bounds = array<i64: 1, 8, 32>}, {transform_indices = @transform_2, window_bounds = array<i64: 1, 8, 32>}, {transform_indices = @transform_3, window_bounds = array<i64: 1, 32, 8>}, {transform_indices = @transform_4, window_bounds = array<i64: 1, 32, 8>}, {transform_indices = @transform_5, window_bounds = array<i64: 1, 32, 8>}, {transform_indices = @transform_6, window_bounds = array<i64: 1, 8, 32>}, {transform_indices = @transform_7, window_bounds = array<i64: 1, 1, 8>}, {transform_indices = @transform_8, window_bounds = array<i64: 1, 1, 8>}, {transform_indices = @transform_9, window_bounds = array<i64: 1, 1, 8>}, {pipeline_mode = #tpu.pipeline_mode<synchronous>, transform_indices = @transform_10, window_bounds = array<i64: 32, 32>}, {pipeline_mode = #tpu.pipeline_mode<synchronous>, transform_indices = @transform_11, window_bounds = array<i64: 1, 32>}, {pipeline_mode = #tpu.pipeline_mode<synchronous>, transform_indices = @transform_12, window_bounds = array<i64: 1, 32>}, {pipeline_mode = #tpu.pipeline_mode<synchronous>, transform_indices = @transform_13, window_bounds = array<i64: 1, 32>}, {pipeline_mode = #tpu.pipeline_mode<synchronous>, transform_indices = @transform_14, window_bounds = array<i64: 1, 32>}, {transform_indices = @transform_15, window_bounds = array<i64: 1, 8, 32>}]} {
    %c0 = arith.constant 0 : index
    %c0_0 = arith.constant 0 : index
    %c0_1 = arith.constant 0 : index
    %0 = vector.load %arg3[%c0, %c0_0, %c0_1] : memref<1x8x32xf32, #tpu.memory_space<vmem>>, vector<1x8x32xf32>
    %1 = vector.shape_cast %0 : vector<1x8x32xf32> to vector<8x32xf32>
    %2 = arith.truncf %1 : vector<8x32xf32> to vector<8x32xbf16>
    %c0_2 = arith.constant 0 : index
    %c0_3 = arith.constant 0 : index
    %c0_4 = arith.constant 0 : index
    %3 = vector.load %arg4[%c0_2, %c0_3, %c0_4] : memref<1x8x32xf32, #tpu.memory_space<vmem>>, vector<1x8x32xf32>
    %4 = vector.shape_cast %3 : vector<1x8x32xf32> to vector<8x32xf32>
    %5 = arith.truncf %4 : vector<8x32xf32> to vector<8x32xbf16>
    %c0_5 = arith.constant 0 : index
    %c0_6 = arith.constant 0 : index
    %c0_7 = arith.constant 0 : index
    %6 = vector.load %arg5[%c0_5, %c0_6, %c0_7] : memref<1x8x32xf32, #tpu.memory_space<vmem>>, vector<1x8x32xf32>
    %7 = vector.shape_cast %6 : vector<1x8x32xf32> to vector<8x32xf32>
    %8 = arith.truncf %7 : vector<8x32xf32> to vector<8x32xbf16>
    %c0_i32 = arith.constant 0 : i32
    %9 = arith.cmpi eq, %arg2, %c0_i32 : i32
    %10 = arith.extui %9 : i1 to i32
    %c0_i32_8 = arith.constant 0 : i32
    %11 = arith.cmpi ne, %10, %c0_i32_8 : i32
    scf.if %11 {
      %c0_42 = arith.constant 0 : index
      %c0_43 = arith.constant 0 : index
      %59 = vector.load %arg13[%c0_42, %c0_43] : memref<32x32xbf16, #tpu.memory_space<vmem>>, vector<32x32xbf16>
      %cst_44 = arith.constant dense<0.000000e+00> : vector<8x32xf32>
      %60 = tpu.matmul %2, %59, %cst_44 {dimension_numbers = #tpu.dot_dimension_numbers<[1], [0], [0], [1], [0, 0, 1, 1], [], []>} : vector<8x32xbf16>, vector<32x32xbf16>, vector<8x32xf32> -> vector<8x32xf32>
      %c0_45 = arith.constant 0 : index
      %c0_46 = arith.constant 0 : index
      %61 = vector.load %arg14[%c0_45, %c0_46] : memref<1x32xf32, #tpu.memory_space<vmem>>, vector<1x32xf32>
      %62 = vector.shape_cast %61 : vector<1x32xf32> to vector<32xf32>
      %63 = vector.shape_cast %62 : vector<32xf32> to vector<1x32xf32>
      %64 = vector.broadcast %63 : vector<1x32xf32> to vector<8x32xf32>
      %65 = arith.addf %60, %64 : vector<8x32xf32>
      %c0_47 = arith.constant 0 : index
      %c0_48 = arith.constant 0 : index
      %66 = vector.load %arg15[%c0_47, %c0_48] : memref<1x32xf32, #tpu.memory_space<vmem>>, vector<1x32xf32>
      %67 = vector.shape_cast %66 : vector<1x32xf32> to vector<32xf32>
      %68 = vector.shape_cast %67 : vector<32xf32> to vector<1x32xf32>
      %69 = vector.broadcast %68 : vector<1x32xf32> to vector<8x32xf32>
      %70 = arith.addf %65, %69 : vector<8x32xf32>
      %c0_49 = arith.constant 0 : index
      %c0_50 = arith.constant 0 : index
      %71 = vector.load %arg19[%c0_49, %c0_50] : memref<8x32xf32, #tpu.memory_space<vmem>>, vector<8x32xf32>
      tpu.vector_store %arg19[%c0_49, %c0_50], %70 {strides = array<i32>} : memref<8x32xf32, #tpu.memory_space<vmem>>, vector<8x32xf32>,
    } else {
    }
    %c0_9 = arith.constant 0 : index
    %c0_10 = arith.constant 0 : index
    %c0_11 = arith.constant 0 : index
    %12 = vector.load %arg6[%c0_9, %c0_10, %c0_11] : memref<1x32x8xbf16, #tpu.memory_space<vmem>>, vector<1x32x8xbf16>
    %13 = vector.shape_cast %12 : vector<1x32x8xbf16> to vector<32x8xbf16>
    %cst = arith.constant dense<0.000000e+00> : vector<8x8xf32>
    %14 = tpu.matmul %2, %13, %cst {dimension_numbers = #tpu.dot_dimension_numbers<[1], [0], [0], [1], [0, 0, 1, 1], [], []>} : vector<8x32xbf16>, vector<32x8xbf16>, vector<8x8xf32> -> vector<8x8xf32>
    %c0_12 = arith.constant 0 : index
    %c0_13 = arith.constant 0 : index
    %c0_14 = arith.constant 0 : index
    %15 = vector.load %arg10[%c0_12, %c0_13, %c0_14] : memref<1x1x8xf32, #tpu.memory_space<vmem>>, vector<1x1x8xf32>
    %16 = vector.shape_cast %15 : vector<1x1x8xf32> to vector<1x8xf32>
    %17 = vector.broadcast %16 : vector<1x8xf32> to vector<8x8xf32>
    %18 = arith.addf %14, %17 : vector<8x8xf32>
    %c0_15 = arith.constant 0 : index
    %c0_16 = arith.constant 0 : index
    %c0_17 = arith.constant 0 : index
    %19 = vector.load %arg7[%c0_15, %c0_16, %c0_17] : memref<1x32x8xbf16, #tpu.memory_space<vmem>>, vector<1x32x8xbf16>
    %20 = vector.shape_cast %19 : vector<1x32x8xbf16> to vector<32x8xbf16>
    %cst_18 = arith.constant dense<0.000000e+00> : vector<8x8xf32>
    %21 = tpu.matmul %5, %20, %cst_18 {dimension_numbers = #tpu.dot_dimension_numbers<[1], [0], [0], [1], [0, 0, 1, 1], [], []>} : vector<8x32xbf16>, vector<32x8xbf16>, vector<8x8xf32> -> vector<8x8xf32>
    %c0_19 = arith.constant 0 : index
    %c0_20 = arith.constant 0 : index
    %c0_21 = arith.constant 0 : index
    %22 = vector.load %arg11[%c0_19, %c0_20, %c0_21] : memref<1x1x8xf32, #tpu.memory_space<vmem>>, vector<1x1x8xf32>
    %23 = vector.shape_cast %22 : vector<1x1x8xf32> to vector<1x8xf32>
    %24 = vector.broadcast %23 : vector<1x8xf32> to vector<8x8xf32>
    %25 = arith.addf %21, %24 : vector<8x8xf32>
    %c0_22 = arith.constant 0 : index
    %c0_23 = arith.constant 0 : index
    %c0_24 = arith.constant 0 : index
    %26 = vector.load %arg8[%c0_22, %c0_23, %c0_24] : memref<1x32x8xbf16, #tpu.memory_space<vmem>>, vector<1x32x8xbf16>
    %27 = vector.shape_cast %26 : vector<1x32x8xbf16> to vector<32x8xbf16>
    %cst_25 = arith.constant dense<0.000000e+00> : vector<8x8xf32>
    %28 = tpu.matmul %8, %27, %cst_25 {dimension_numbers = #tpu.dot_dimension_numbers<[1], [0], [0], [1], [0, 0, 1, 1], [], []>} : vector<8x32xbf16>, vector<32x8xbf16>, vector<8x8xf32> -> vector<8x8xf32>
    %c0_26 = arith.constant 0 : index
    %c0_27 = arith.constant 0 : index
    %c0_28 = arith.constant 0 : index
    %29 = vector.load %arg12[%c0_26, %c0_27, %c0_28] : memref<1x1x8xf32, #tpu.memory_space<vmem>>, vector<1x1x8xf32>
    %30 = vector.shape_cast %29 : vector<1x1x8xf32> to vector<1x8xf32>
    %31 = vector.broadcast %30 : vector<1x8xf32> to vector<8x8xf32>
    %32 = arith.addf %28, %31 : vector<8x8xf32>
    %33 = arith.truncf %18 : vector<8x8xf32> to vector<8x8xbf16>
    %34 = arith.truncf %25 : vector<8x8xf32> to vector<8x8xbf16>
    "tpu.trace_start"() <{level = 10 : i32, message = "qd,kd->qk"}> : () -> ()
    %cst_29 = arith.constant dense<0.000000e+00> : vector<8x8xf32>
    %35 = tpu.matmul %33, %34, %cst_29 {dimension_numbers = #tpu.dot_dimension_numbers<[1], [1], [0], [0], [0, 0, 1, 0], [], []>} : vector<8x8xbf16>, vector<8x8xbf16>, vector<8x8xf32> -> vector<8x8xf32>
    "tpu.trace_stop"() : () -> ()
    %cst_30 = arith.constant dense<0xFF800000> : vector<8xf32>
    %36 = vector.multi_reduction <maximumf>, %35, %cst_30 [1] : vector<8x8xf32> to vector<8xf32>
    %37 = vector.shape_cast %36 : vector<8xf32> to vector<8x1xf32>
    %38 = vector.broadcast %37 : vector<8x1xf32> to vector<8x8xf32>
    %39 = arith.subf %35, %38 : vector<8x8xf32>
    %40 = math.exp %39 : vector<8x8xf32>
    %cst_31 = arith.constant dense<0.000000e+00> : vector<8xf32>
    %41 = vector.multi_reduction <add>, %40, %cst_31 [1] : vector<8x8xf32> to vector<8xf32>
    %42 = vector.shape_cast %41 : vector<8xf32> to vector<8x1xf32>
    %43 = tpu.reciprocal %42 {approx = true} : vector<8x1xf32> -> vector<8x1xf32>
    %44 = vector.broadcast %43 : vector<8x1xf32> to vector<8x8xf32>
    %45 = arith.mulf %40, %44 : vector<8x8xf32>
    %46 = arith.truncf %45 : vector<8x8xf32> to vector<8x8xbf16>
    %47 = arith.truncf %32 : vector<8x8xf32> to vector<8x8xbf16>
    %cst_32 = arith.constant dense<0.000000e+00> : vector<8x8xf32>
    %48 = tpu.matmul %46, %47, %cst_32 {dimension_numbers = #tpu.dot_dimension_numbers<[1], [0], [0], [1], [0, 0, 1, 1], [], []>} : vector<8x8xbf16>, vector<8x8xbf16>, vector<8x8xf32> -> vector<8x8xf32>
    %c0_33 = arith.constant 0 : index
    %c0_34 = arith.constant 0 : index
    %49 = vector.load %arg19[%c0_33, %c0_34] : memref<8x32xf32, #tpu.memory_space<vmem>>, vector<8x32xf32>
    %50 = arith.truncf %48 : vector<8x8xf32> to vector<8x8xbf16>
    %c0_35 = arith.constant 0 : index
    %c0_36 = arith.constant 0 : index
    %c0_37 = arith.constant 0 : index
    %51 = vector.load %arg9[%c0_35, %c0_36, %c0_37] : memref<1x8x32xbf16, #tpu.memory_space<vmem>>, vector<1x8x32xbf16>
    %52 = vector.shape_cast %51 : vector<1x8x32xbf16> to vector<8x32xbf16>
    %cst_38 = arith.constant dense<0.000000e+00> : vector<8x32xf32>
    %53 = tpu.matmul %50, %52, %cst_38 {dimension_numbers = #tpu.dot_dimension_numbers<[1], [0], [0], [1], [0, 0, 1, 1], [], []>} : vector<8x8xbf16>, vector<8x32xbf16>, vector<8x32xf32> -> vector<8x32xf32>
    %54 = arith.addf %49, %53 : vector<8x32xf32>
    %c0_39 = arith.constant 0 : index
    %c0_40 = arith.constant 0 : index
    %55 = vector.load %arg19[%c0_39, %c0_40] : memref<8x32xf32, #tpu.memory_space<vmem>>, vector<8x32xf32>
    tpu.vector_store %arg19[%c0_39, %c0_40], %54 {strides = array<i32>} : memref<8x32xf32, #tpu.memory_space<vmem>>, vector<8x32xf32>,
    %c3_i32 = arith.constant 3 : i32
    %56 = arith.cmpi eq, %arg2, %c3_i32 : i32
    %57 = arith.extui %56 : i1 to i32
    %c0_i32_41 = arith.constant 0 : i32
    %58 = arith.cmpi ne, %57, %c0_i32_41 : i32
    scf.if %58 {
      %c0_42 = arith.constant 0 : index
      %c0_43 = arith.constant 0 : index
      %59 = vector.load %arg19[%c0_42, %c0_43] : memref<8x32xf32, #tpu.memory_space<vmem>>, vector<8x32xf32>
      %cst_44 = arith.constant dense<0.000000e+00> : vector<8xf32>
      %60 = vector.multi_reduction <add>, %59, %cst_44 [1] : vector<8x32xf32> to vector<8xf32>
      %61 = vector.shape_cast %60 : vector<8xf32> to vector<8x1xf32>
      %cst_45 = arith.constant 3.200000e+01 : f32
      %62 = vector.broadcast %cst_45 : f32 to vector<8x1xf32>
      %63 = arith.divf %61, %62 : vector<8x1xf32>
      %64 = vector.broadcast %63 : vector<8x1xf32> to vector<8x32xf32>
      %65 = arith.subf %59, %64 : vector<8x32xf32>
      %66 = arith.mulf %65, %65 : vector<8x32xf32>
      %cst_46 = arith.constant dense<0.000000e+00> : vector<8xf32>
      %67 = vector.multi_reduction <add>, %66, %cst_46 [1] : vector<8x32xf32> to vector<8xf32>
      %68 = vector.shape_cast %67 : vector<8xf32> to vector<8x1xf32>
      %cst_47 = arith.constant 3.200000e+01 : f32
      %69 = vector.broadcast %cst_47 : f32 to vector<8x1xf32>
      %70 = arith.divf %68, %69 : vector<8x1xf32>
      %cst_48 = arith.constant 9.99999974E-6 : f32
      %71 = vector.broadcast %cst_48 : f32 to vector<8x1xf32>
      %72 = arith.addf %70, %71 : vector<8x1xf32>
      %73 = math.rsqrt %72 : vector<8x1xf32>
      %74 = vector.broadcast %73 : vector<8x1xf32> to vector<8x32xf32>
      %75 = arith.mulf %65, %74 : vector<8x32xf32>
      %c0_49 = arith.constant 0 : index
      %c0_50 = arith.constant 0 : index
      %76 = vector.load %arg16[%c0_49, %c0_50] : memref<1x32xf32, #tpu.memory_space<vmem>>, vector<1x32xf32>
      %77 = vector.shape_cast %76 : vector<1x32xf32> to vector<32xf32>
      %78 = vector.shape_cast %77 : vector<32xf32> to vector<1x32xf32>
      %79 = vector.broadcast %78 : vector<1x32xf32> to vector<8x32xf32>
      %80 = arith.mulf %75, %79 : vector<8x32xf32>
      %c0_51 = arith.constant 0 : index
      %c0_52 = arith.constant 0 : index
      %81 = vector.load %arg17[%c0_51, %c0_52] : memref<1x32xf32, #tpu.memory_space<vmem>>, vector<1x32xf32>
      %82 = vector.shape_cast %81 : vector<1x32xf32> to vector<32xf32>
      %83 = vector.shape_cast %82 : vector<32xf32> to vector<1x32xf32>
      %84 = vector.broadcast %83 : vector<1x32xf32> to vector<8x32xf32>
      %85 = arith.addf %80, %84 : vector<8x32xf32>
      %c0_53 = arith.constant 0 : index
      %c0_54 = arith.constant 0 : index
      %c0_55 = arith.constant 0 : index
      %86 = vector.load %arg18[%c0_53, %c0_54, %c0_55] : memref<1x8x32xf32, #tpu.memory_space<vmem>>, vector<1x8x32xf32>
      %87 = vector.shape_cast %86 : vector<1x8x32xf32> to vector<8x32xf32>
      %88 = vector.shape_cast %85 : vector<8x32xf32> to vector<1x8x32xf32>
      tpu.vector_store %arg18[%c0_53, %c0_54, %c0_55], %88 {strides = array<i32>} : memref<1x8x32xf32, #tpu.memory_space<vmem>>, vector<1x8x32xf32>,
    } else {
    }
    return
  }
  func.func @transform_0(%arg0: i32, %arg1: i32, %arg2: i32) -> (i32, i32, i32) {
    %c0_i32 = arith.constant 0 : i32
    %c0_i32_0 = arith.constant 0 : i32
    return %arg0, %arg1, %c0_i32 : i32, i32, i32
  }
  func.func @transform_1(%arg0: i32, %arg1: i32, %arg2: i32) -> (i32, i32, i32) {
    %c0_i32 = arith.constant 0 : i32
    %c0_i32_0 = arith.constant 0 : i32
    %c0_i32_1 = arith.constant 0 : i32
    return %arg0, %c0_i32, %c0_i32_0 : i32, i32, i32
  }
  func.func @transform_2(%arg0: i32, %arg1: i32, %arg2: i32) -> (i32, i32, i32) {
    %c0_i32 = arith.constant 0 : i32
    %c0_i32_0 = arith.constant 0 : i32
    %c0_i32_1 = arith.constant 0 : i32
    return %arg0, %c0_i32, %c0_i32_0 : i32, i32, i32
  }
  func.func @transform_3(%arg0: i32, %arg1: i32, %arg2: i32) -> (i32, i32, i32) {
    %c0_i32 = arith.constant 0 : i32
    %c0_i32_0 = arith.constant 0 : i32
    %c0_i32_1 = arith.constant 0 : i32
    return %arg2, %c0_i32, %c0_i32_0 : i32, i32, i32
  }
  func.func @transform_4(%arg0: i32, %arg1: i32, %arg2: i32) -> (i32, i32, i32) {
    %c0_i32 = arith.constant 0 : i32
    %c0_i32_0 = arith.constant 0 : i32
    %c0_i32_1 = arith.constant 0 : i32
    return %arg2, %c0_i32, %c0_i32_0 : i32, i32, i32
  }
  func.func @transform_5(%arg0: i32, %arg1: i32, %arg2: i32) -> (i32, i32, i32) {
    %c0_i32 = arith.constant 0 : i32
    %c0_i32_0 = arith.constant 0 : i32
    %c0_i32_1 = arith.constant 0 : i32
    return %arg2, %c0_i32, %c0_i32_0 : i32, i32, i32
  }
  func.func @transform_6(%arg0: i32, %arg1: i32, %arg2: i32) -> (i32, i32, i32) {
    %c0_i32 = arith.constant 0 : i32
    %c0_i32_0 = arith.constant 0 : i32
    %c0_i32_1 = arith.constant 0 : i32
    return %arg2, %c0_i32, %c0_i32_0 : i32, i32, i32
  }
  func.func @transform_7(%arg0: i32, %arg1: i32, %arg2: i32) -> (i32, i32, i32) {
    %c0_i32 = arith.constant 0 : i32
    %c0_i32_0 = arith.constant 0 : i32
    %c0_i32_1 = arith.constant 0 : i32
    return %arg2, %c0_i32, %c0_i32_0 : i32, i32, i32
  }
  func.func @transform_8(%arg0: i32, %arg1: i32, %arg2: i32) -> (i32, i32, i32) {
    %c0_i32 = arith.constant 0 : i32
    %c0_i32_0 = arith.constant 0 : i32
    %c0_i32_1 = arith.constant 0 : i32
    return %arg2, %c0_i32, %c0_i32_0 : i32, i32, i32
  }
  func.func @transform_9(%arg0: i32, %arg1: i32, %arg2: i32) -> (i32, i32, i32) {
    %c0_i32 = arith.constant 0 : i32
    %c0_i32_0 = arith.constant 0 : i32
    %c0_i32_1 = arith.constant 0 : i32
    return %arg2, %c0_i32, %c0_i32_0 : i32, i32, i32
  }
  func.func @transform_10(%arg0: i32, %arg1: i32, %arg2: i32) -> (i32, i32) {
    %c0_i32 = arith.constant 0 : i32
    %c0_i32_0 = arith.constant 0 : i32
    %c0_i32_1 = arith.constant 0 : i32
    return %c0_i32, %c0_i32_0 : i32, i32
  }
  func.func @transform_11(%arg0: i32, %arg1: i32, %arg2: i32) -> (i32, i32) {
    %c0_i32 = arith.constant 0 : i32
    %c0_i32_0 = arith.constant 0 : i32
    %c0_i32_1 = arith.constant 0 : i32
    return %c0_i32, %c0_i32_0 : i32, i32
  }
  func.func @transform_12(%arg0: i32, %arg1: i32, %arg2: i32) -> (i32, i32) {
    %c0_i32 = arith.constant 0 : i32
    %c0_i32_0 = arith.constant 0 : i32
    %c0_i32_1 = arith.constant 0 : i32
    return %c0_i32, %c0_i32_0 : i32, i32
  }
  func.func @transform_13(%arg0: i32, %arg1: i32, %arg2: i32) -> (i32, i32) {
    %c0_i32 = arith.constant 0 : i32
    %c0_i32_0 = arith.constant 0 : i32
    %c0_i32_1 = arith.constant 0 : i32
    return %c0_i32, %c0_i32_0 : i32, i32
  }
  func.func @transform_14(%arg0: i32, %arg1: i32, %arg2: i32) -> (i32, i32) {
    %c0_i32 = arith.constant 0 : i32
    %c0_i32_0 = arith.constant 0 : i32
    %c0_i32_1 = arith.constant 0 : i32
    return %c0_i32, %c0_i32_0 : i32, i32
  }
  func.func @transform_15(%arg0: i32, %arg1: i32, %arg2: i32) -> (i32, i32, i32) {
    %c0_i32 = arith.constant 0 : i32
    %c0_i32_0 = arith.constant 0 : i32
    return %arg0, %arg1, %c0_i32 : i32, i32, i32
  }
}

</mosaic_0001>

<bundles_post_ra>
// kernel: tpu_custom_call.1
= control target key start
LH: loop header
LB: loop body
LE: loop exit
PB: predicated region body
PF: predicated region fallthrough
CT: control target
= control target key end

     0   :  { %s1973_s0 = inlined_call_operand.vmem [shape: f32[2,8,32], index: 0, kind: input, shape index: {}]   ;;  %s1974_s1 = inlined_call_operand.vmem [shape: f32[2,8,32], index: 1, kind: input, shape index: {}]   ;;  %s1975_s2 = inlined_call_operand.vmem [shape: f32[2,8,32], index: 2, kind: input, shape index: {}]   ;;  %s1976_s3 = inlined_call_operand.vmem [shape: bf16[4,32,8], index: 3, kind: input, shape index: {}]   ;;  %s1977_s4 = inlined_call_operand.vmem [shape: bf16[4,32,8], index: 4, kind: input, shape index: {}]   ;;  %s1978_s5 = inlined_call_operand.vmem [shape: bf16[4,32,8], index: 5, kind: input, shape index: {}]   ;;  %s1979_s6 = inlined_call_operand.vmem [shape: bf16[4,8,32], index: 6, kind: input, shape index: {}]   ;;  %s1980_s7 = inlined_call_operand.vmem [shape: f32[4,1,8], index: 7, kind: input, shape index: {}]   ;;  %s1981_s8 = inlined_call_operand.vmem [shape: f32[4,1,8], index: 8, kind: input, shape index: {}]   ;;  %s1982_s9 = inlined_call_operand.vmem [shape: f32[4,1,8], index: 9, kind: input, shape index: {}]   ;;  %s1983_s10 = inlined_call_operand.vmem [shape: bf16[32,32], index: 10, kind: input, shape index: {}]   ;;  %s1984_s11 = inlined_call_operand.vmem [shape: f32[1,32], index: 11, kind: input, shape index: {}]   ;;  %s1985_s12 = inlined_call_operand.vmem [shape: f32[1,32], index: 12, kind: input, shape index: {}]   ;;  %s1986_s13 = inlined_call_operand.vmem [shape: f32[1,32], index: 13, kind: input, shape index: {}]   ;;  %s1987_s14 = inlined_call_operand.vmem [shape: f32[1,32], index: 14, kind: input, shape index: {}]   ;;  %s1988_s15 = inlined_call_operand.hbm [shape: f32[2,8,32], index: 15, kind: output, shape index: {}]  }
   0x1   :  { %2003 = sst [smem:[#allocation18_spill]] %s1973_s0 }
   0x2   :  { %2004 = sst [smem:[#allocation19_spill]] %s1974_s1 }
   0x3   :  { %2005 = sst [smem:[#allocation20_spill]] %s1975_s2 }
   0x4   :  { %2006 = sst [smem:[#allocation21_spill]] %s1976_s3 }
   0x5   :  { %2007 = sst [smem:[#allocation22_spill]] %s1977_s4 }
   0x6   :  { %2008 = sst [smem:[#allocation23_spill]] %s1988_s15 }
   0x7   :  { %20 = vsyncpa [#allocation4], 0 }
   0x8   :  { %22 = vsyncpa [#allocation4 + $0x1], 0  ;;  %s1731_s18 = smov 0   ;;  %s1733_s19 = smov 0  }
   0x9   :  { %s1735_s20 = smov 0   ;;  %s1737_s21 = smov 0  }
   0xa   :  { %s1739_s22 = smov 0   ;;  %s1741_s23 = smov 0  }
   0xb   :  { %s1743_s24 = smov 0   ;;  %s1745_s25 = smov 0  }
   0xc LB: > { %2009 = sst [smem:[#allocation6_spill]] %s1616_s18  ;;  %s1348_s26 = sadd.s32 4294967295, %s1644_s25   ;;  %s1644_s25 = sphi %s1745_s25, %s28_s25   ;;  %s1640_s24 = sphi %s1743_s24, %s2042_s24   ;;  %s1636_s23 = sphi %s1741_s23, %s2041_s23   ;;  %s1632_s22 = sphi %s1739_s22, %s2040_s22   ;;  %s1628_s21 = sphi %s1737_s21, %s2039_s21   ;;  %s1624_s20 = sphi %s1735_s20, %s2038_s20   ;;  %s1620_s19 = sphi %s1733_s19, %s2037_s19   ;;  %s1616_s18 = sphi %s1731_s18, %s2036_s18  }
   0xd   : > { %2010 = sst [smem:[#allocation7_spill]] %s1620_s19  ;;  %s1349_s27 = sadd.s32 4294967294, %s1644_s25  }
   0xe   : > { %2011 = sst [smem:[#allocation8_spill]] %s1624_s20  ;;  %s40_s28 = sadd.s32 1, %s1636_s23 }
   0xf   : > { %2012 = sst [smem:[#allocation9_spill]] %s1632_s22  ;;  %p41_p0 = scmp.ge.s32.totalorder %s40_s28, 4 }
  0x10   : > { %2013 = sst [smem:[#allocation10_spill]] %s1636_s23  ;;  %s47_s29 = sadd.s32 1, %s1640_s24 }
  0x11   : > { %2014 = sst [smem:[#allocation11_spill]] %s1640_s24  ;;  %p433_p1 = scmp.ne.s32.totalorder %s1624_s20, %s1620_s19 }
  0x12   : > { %2015 = sst [smem:[#allocation12_spill]] %s1644_s25  ;;  %p434_p2 = scmp.eq.s32.totalorder %s1348_s26, 7 }
  0x13   : > { %s2044_s28 = smov (%p41_p0, %s40_s28), 0  ;;  %s2046_s29 = smov (!%p41_p0, %s47_s29), %s1640_s24 }
  0x14   : > { %2016 = sst [smem:[#allocation13_spill]] %s2044_s28  ;;  %p1780_p3 = por %p434_p2, %p433_p1 }
  0x15   : > { %p439_p4 = scmp.ne.s32.totalorder %s1620_s19, %s1616_s18  ;;  %p49_p5 = scmp.ge.s32.totalorder %s2046_s29, 2 }
  0x16   : > { %s2017_s30 = scalar_select %p1780_p3, 1, 0 }
  0x17   : > { %p440_p6 = scmp.eq.s32.totalorder %s1349_s27, 7  ;;  %p1352_p7 = scmp.ge.s32.totalorder %s1644_s25, 1 }
  0x18   : > { %2018 = sst [smem:[#allocation14_spill]] %s2017_s30  ;;  %p546_p8 = scmp.lt.s32.totalorder %s1644_s25, 9 }
  0x19   : > { %s2048_s29 = smov (%p49_p5, %s2046_s29), 0  ;;  %p1790_p9 = por %p440_p6, %p439_p4 }
  0x1a   : > { %2019 = sst [smem:[#allocation15_spill]] %s2048_s29  ;;  %p547_p10 = pnand %p1352_p7, %p546_p8 }
  0x1b   : > { %s2020_s16 = scalar_select %p1790_p9, 1, 0 }
  0x1c   : > { %s418_s17 = ssub.s32 %s1640_s24, %s2048_s29  ;;  %s423_s26 = sadd.s32 1, %s1624_s20 }
  0x1d   : > { %2021 = sst [smem:[#allocation16_spill]] %s2020_s16  ;;  %p421_p11 = scmp.eq.s32.totalorder %s418_s17, 0 }
  0x1e   : > { %550 = sbr.rel (%p547_p10) target bundleno = 1708 (0x6ac), region = 80  ;;  %s1998_s27 = sand.u32 (!%p547_p10), 1, %s1620_s19  }
  0x1f   : > { %s1798_s28 = scalar_select %p421_p11, %s1624_s20, %s423_s26  }
  0x20   : > { %p632_p12 = scmp.lt.s32.totalorder (!%p547_p10), %s1632_s22, 1  ;;  %s1804_s23 = sshll.u32 (!%p547_p10), %s1998_s27, 3 }
  0x21   : > { %2022 = sst [smem:[#allocation17_spill]] %s1798_s28  ;;  %p647_p13 = scmp.lt.s32.totalorder (!%p547_p10), %s1628_s21, 3 }
  0x22   : > { %s2023_s0 = sld [smem:[#allocation18_spill]] (!%p547_p10)  ;;  %p1364_p0 = scmp.ne.s32.totalorder (!%p547_p10), %s1628_s21, 0 }
  0x23   : > { %s633_s16 = scalar_select %p632_p12, %s1632_s22, 1 }
  0x24   : > { %s1809_s18 = scalar_select %p647_p13, %s1628_s21, 3 }
  0x25   : > { %s1354_s17 = sshll.u32 %s633_s16, 3  ;;  %s2024_s1 = sld [smem:[#allocation19_spill]] }
  0x26   : > { %s2025_s2 = sld [smem:[#allocation20_spill]]  ;;  %s1392_s19 = sshll.u32 %s1809_s18, 4 }
  0x27   : > { %s2026_s3 = sld [smem:[#allocation21_spill]]  ;;  %s1836_s27 = scalar_lea.vmem %s1978_s5, %s1392_s19 }
  0x28   : > { %s638_s24 = scalar_lea.vmem %s2023_s0, %s1354_s17  ;;  %s2027_s4 = sld [smem:[#allocation22_spill]] }
  0x29   : > { %v676_v0 = vld [vmem:[%s638_s24] sm:$0xff]  ;;  %s1363_s24 = sshll.u32 %s1809_s18, 2  ;;  %s668_s26 = scalar_lea.vmem %s1980_s7, %s1809_s18 }
  0x2a   : > { %v677_v2 = vpack.c.bf16 %v676_v0, %v676_v0  ;;  %s674_s28 = scalar_lea.vmem %s1982_s9, %s1809_s18  ;;  %685 = sbr.rel (%p1364_p0) target bundleno = 255 (0xff), region = 84 }
  0x2b   : > { %s642_s25 = scalar_lea.vmem %s2024_s1, %s1354_s17 }
  0x2c   : > { %s646_s30 = scalar_lea.vmem %s2025_s2, %s1354_s17  ;;  %v678_v1 = vld [vmem:[%s642_s25] sm:$0xff]  ;;  %s1844_s17 = scalar_lea.vmem %s1979_s6, %s1363_s24 }
  0x2d   : > { %s1824_s29 = scalar_lea.vmem %s2026_s3, %s1392_s19  ;;  %v679_v3 = vpack.c.bf16 %v678_v1, %v678_v1  ;;  %v1831_v4 = vld [vmem:[%s646_s30] sm:$0xff]  ;;  %s671_s2 = scalar_lea.vmem %s1981_s8, %s1809_s18 }
  0x2e   : > { %s1829_s20 = scalar_lea.vmem %s2027_s4, %s1392_s19  ;;  %v681_v5 = vpack.c.bf16 %v1831_v4, %v1831_v4  ;;  %s631_s3 = scalar_lea.vmem [#allocation3], %s1804_s23 }
  0x2f   : > { %v1538_v6 = vld [vmem:[%s1983_s10 + $0x8] sm:$0xff]   ;;  %v1646_v7 = vmov 0.0   ;;  %v1539_v8 = vld [vmem:[%s1983_s10] sm:$0xff]   ;;  %vm1647_vm0 = vmmov 0   ;;  %vm709_vm1 = vcmask 261120  }
  0x30   : > { %1413 = vmatprep.subr.bf16.mxu0 %v1646_v7  ;;  %1417 = vmatprep.mubr.msk.bf16.mxu0 %vm1647_vm0, %v1646_v7  ;;  %v1365_v9 = vld [vmem:[%s1984_s11] ss:$0 sm:$0xff] }
  0x31   : > { %1414 = vmatpush3.bf16.msra.mxu0 %v1538_v6  ;;  %v1369_v11 = vld [vmem:[%s1985_s12] ss:$0 sm:$0xff] }
  0x32   : > { %1415 = vmatprep.subr.bf16.mxu0 %v1646_v7 }
  0x35   : > { %1416 = vmatpush3.bf16.msra.mxu0 %v1539_v8 }
  0x38   : > { %1418 = vmatmul.mubr.msk.bf16.vlgmr.msra.gmra.mxu0 %vm709_vm1, %v677_v2 }
  0xf8   : > { %v747_v10 = vpop.f32.mrf.mxu0 }
  0xf9   : > { %v748_v12 = vadd.f32 %v1365_v9, %v747_v10 }
  0xfa   : > { %v1419_v13 = vpop.f32.mrf.mxu0 }
  0xfb   : > { %v760_v14 = vadd.f32 %v1369_v11, %v748_v12 }
  0xfc   : > { %v750_v15 = vpop.f32.mrf.mxu0 }
  0xfd   : > { %761 = vst.msk [vmem:[#allocation2] sm:$0xff] %vm709_vm1, %v760_v14 }
  0xfe   : > { %v1420_v16 = vpop.f32.mrf.mxu0 }
  0xff PF: > { %v1540_v17 = vld [vmem:[%s1829_s20 + $0x8] sm:$0xff]   ;;  %v1648_v18 = vmov 0.0   ;;  %v1542_v20 = vld [vmem:[%s1829_s20] sm:$0xff]   ;;  %vm1649_vm2 = vmmov 0   ;;  %vm785_vm3 = vcmask 261120   ;;  %vm963_vm4 = vcmask 64512  }
 0x100   : > { %1429 = vmatprep.subr.bf16.mxu1 %v1648_v18  ;;  %1421 = vmatprep.subr.bf16.mxu0 %v1648_v18  ;;  %v1541_v19 = vld [vmem:[%s1824_s29 + $0x8] sm:$0xff]   ;;  %v1543_v21 = vld [vmem:[%s1824_s29] sm:$0xff]   ;;  %vm1026_vm5 = vcmask 1043456   ;;  %p1385_p1 = scmp.ne.s32.totalorder %s1628_s21, 3 }
 0x101   : > { %1430 = vmatpush3.bf16.msra.mxu1 %v1540_v17  ;;  %1433 = vmatprep.mubr.msk.bf16.mxu1 %vm1649_vm2, %v1648_v18  ;;  %v1374_v22 = vld [vmem:[%s671_s2] ss:$0 sm:$0xff]  ;;  %v1544_v37 = vld [vmem:[%s1836_s27 + $0x8] sm:$0xff]  }
 0x102   : > { %1422 = vmatpush3.bf16.msra.mxu0 %v1541_v19  ;;  %1431 = vmatprep.subr.bf16.mxu1 %v1648_v18  ;;  %v1370_v27 = vld [vmem:[%s668_s26] ss:$0 sm:$0xff] }
 0x103   : > { %1423 = vmatprep.subr.bf16.mxu0 %v1648_v18  ;;  %1425 = vmatprep.mubr.msk.bf16.mxu0 %vm1649_vm2, %v1648_v18  ;;  %v1545_v38 = vld [vmem:[%s1836_s27] sm:$0xff]  }
 0x104   : > { %v1378_v49 = vld [vmem:[%s674_s28] ss:$0 sm:$0xff] }
 0x105   : > { %1432 = vmatpush3.bf16.msra.mxu1 %v1542_v20  ;;  %v1072_v57 = vld [vmem:[%s1844_s17] sm:$0xf] }
 0x106   : > { %1424 = vmatpush3.bf16.msra.mxu0 %v1543_v21  ;;  %1445 = vmatprep.subr.bf16.mxu1 %v1648_v18  ;;  %v1077_v58 = vsel %vm1026_vm5, %v1072_v57, 0  ;;  %v1070_v4 = vld [vmem:[#allocation2] sm:$0xff] }
 0x107   : > { %1437 = vmatprep.subr.bf16.mxu0 %v1648_v18 }
 0x108   : > { %1434 = vmatmul.mubr.msk.bf16.vlgmr.msra.gmra.mxu1 %vm785_vm3, %v679_v3 }
 0x109   : > { %1426 = vmatmul.mubr.msk.bf16.vlgmr.msra.gmra.mxu0 %vm785_vm3, %v677_v2  ;;  %1447 = vmatprep.mubr.msk.bf16.mxu1 %vm1649_vm2, %v1648_v18 }
 0x10a   : > { %1441 = vmatprep.mubr.msk.bf16.mxu0 %vm1649_vm2, %v1648_v18  ;;  %1438 = vmatpush3.bf16.msra.mxu0 %v1544_v37 }
 0x10b   : > { %1439 = vmatprep.subr.bf16.mxu0 %v1648_v18 }
 0x10e   : > { %1440 = vmatpush3.bf16.msra.mxu0 %v1545_v38 }
 0x10f   : > { %1451 = vmatprep.subr.bf16.mxu0 %v1648_v18 }
 0x111   : > { %1442 = vmatmul.mubr.msk.bf16.vlgmr.msra.gmra.mxu0 %vm785_vm3, %v681_v5 }
 0x112   : > { %1453 = vmatprep.mubr.msk.bf16.mxu0 %vm1649_vm2, %v1648_v18 }
 0x1c8   : > { %v889_v23 = vpop.f32.mrf.mxu1 }
 0x1c9   : > { %v890_v24 = vadd.f32 %v1374_v22, %v889_v23  ;;  %v823_v25 = vpop.f32.mrf.mxu0 }
 0x1ca   : > { %v1435_v26 = vpop.f32.mrf.mxu1  ;;  %v824_v32 = vadd.f32 %v1370_v27, %v823_v25 }
 0x1cb   : > { %v962_v28 = vpack.c.bf16 %v890_v24, %v890_v24  ;;  %v1427_v29 = vpop.f32.mrf.mxu0 }
 0x1cc   : > { %v892_v30 = vpop.f32.mrf.mxu1  ;;  %v961_v36 = vpack.c.bf16 %v824_v32, %v824_v32 }
 0x1cd   : > { %v968_v31 = vsel %vm963_vm4, %v962_v28, 0  ;;  %v826_v33 = vpop.f32.mrf.mxu0 }
 0x1ce   : > { %v1436_v34 = vpop.f32.mrf.mxu1  ;;  %1446 = vmatpush3.bf16.xpose.msra.mxu1 %v968_v31 }
 0x1cf   : > { %v1428_v35 = vpop.f32.mrf.mxu0  ;;  %1457 = vmatprep.subr.bf16.mxu1 %v1648_v18 }
 0x1d1   : > { %v955_v50 = vpop.f32.mrf.mxu0 }
 0x1d2   : > { %v956_v51 = vadd.f32 %v1378_v49, %v955_v50 }
 0x1d3   : > { %v1443_v52 = vpop.f32.mrf.mxu0 }
 0x1d4   : > { %v1022_v53 = vpack.c.bf16 %v956_v51, %v956_v51 }
 0x1d5   : > { %1448 = vmatmul.mubr.msk.bf16.vlgmr.msra.gmra.mxu1 %vm963_vm4, %v961_v36  ;;  %v958_v54 = vpop.f32.mrf.mxu0 }
 0x1d6   : > { %1459 = vmatprep.mubr.msk.bf16.mxu1 %vm1649_vm2, %v1648_v18  ;;  %v1028_v55 = vsel %vm1026_vm5, %v1022_v53, 0  ;;  %1458 = vmatpush3.bf16.msra.mxu1 %v1077_v58 }
 0x1d7   : > { %v1444_v56 = vpop.f32.mrf.mxu0  ;;  %1452 = vmatpush3.bf16.msra.mxu0 %v1028_v55 }
 0x295   : > { %v1004_v39 = vpop.f32.mrf.mxu1 }
 0x296   : > { %v1010_v40 = vsel %vm963_vm4, %v1004_v39, -inf }
 0x297   : > { %1011 = vmax.xlane.f32.xlu0 %v1010_v40  ;;  %v1449_v41 = vpop.f32.mrf.mxu1 }
 0x299   : > { %v1007_v42 = vpop.f32.mrf.mxu1 }
 0x29b   : > { %v1450_v43 = vpop.f32.mrf.mxu1 }
 0x320   : > { %v1012_v44 = vpop.xlane.xlu0 %1011 }
 0x321   : > { %v1013_v45 = vsub.f32 %v1004_v39, %v1012_v44 }
 0x323   : > { %v1014_v46 = vmul.f32 1.442695, %v1013_v45 }
 0x325   : > { %1546 = vpow2.f32 %v1014_v46 }
 0x332   : > { %v1547_v47 = vpop.eup %1546 }
 0x333   : > { %v1016_v48 = vsel %vm963_vm4, %v1547_v47, 0.0 }
 0x334   : > { %1017 = vadd.xlane.f32.xlu0 %v1016_v48 }
 0x3bd   : > { %v1018_v59 = vpop.xlane.xlu0 %1017 }
 0x3be   : > { %1548 = vrcp.f32 %v1018_v59 }
 0x3cb   : > { %v1549_v60 = vpop.eup %1548 }
 0x3cc   : > { %v1020_v61 = vmul.f32 %v1549_v60, %v1547_v47 }
 0x3ce   : > { %v1021_v62 = vpack.c.bf16 %v1020_v61, %v1020_v61 }
 0x3d0   : > { %1454 = vmatmul.mubr.msk.bf16.vlgmr.msra.gmra.mxu0 %vm963_vm4, %v1021_v62 }
 0x490   : > { %v1064_v63 = vpop.f32.mrf.mxu0 }
 0x491   : > { %v1071_v0 = vpack.c.bf16 %v1064_v63, %v1064_v63 }
 0x492   : > { %v1455_v1 = vpop.f32.mrf.mxu0 }
 0x493   : > { %1460 = vmatmul.mubr.msk.bf16.vlgmr.msra.gmra.mxu1 %vm963_vm4, %v1071_v0 }
 0x494   : > { %v1067_v2 = vpop.f32.mrf.mxu0 }
 0x496   : > { %v1456_v3 = vpop.f32.mrf.mxu0 }
 0x553   : > { %v1113_v5 = vpop.f32.mrf.mxu1 }
 0x554   : > { %v1119_v6 = vadd.f32 %v1113_v5, %v1070_v4 }
 0x555   : > { %v1461_v7 = vpop.f32.mrf.mxu1  ;;  %1124 = sbr.rel (%p1385_p1) target bundleno = 1683 (0x693), region = 88 }
 0x556   : > { %1120 = vst.msk [vmem:[#allocation2] sm:$0xff] %vm785_vm3, %v1119_v6 }
 0x557   : > { %v1116_v8 = vpop.f32.mrf.mxu1 }
 0x559   : > { %v1462_v9 = vpop.f32.mrf.mxu1 }
 0x55a   : > { %v1386_v21 = vld [vmem:[%s1986_s13] ss:$0 sm:$0xff] }
 0x55b   : > { %v1387_v23 = vld [vmem:[%s1987_s14] ss:$0 sm:$0xff] }
 0x55d   : > { %v1125_v10 = vld [vmem:[#allocation2] sm:$0xff] }
 0x55e   : > { %v1126_v11 = vsel %vm785_vm3, %v1125_v10, 0.0 }
 0x55f   : > { %1127 = vadd.xlane.f32.xlu0 %v1126_v11 }
 0x5e8   : > { %v1128_v12 = vpop.xlane.xlu0 %1127 }
 0x5e9   : > { %v1130_v13 = vmul.f32 0.03125, %v1128_v12 }
 0x5eb   : > { %v1131_v14 = vsub.f32 %v1125_v10, %v1130_v13 }
 0x5ed   : > { %v1132_v15 = vmul.f32 %v1131_v14, %v1131_v14 }
 0x5ef   : > { %v1133_v16 = vsel %vm785_vm3, %v1132_v15, 0.0 }
 0x5f0   : > { %1134 = vadd.xlane.f32.xlu0 %v1133_v16 }
 0x679   : > { %v1135_v17 = vpop.xlane.xlu0 %1134 }
 0x67a   : > { %v1136_v18 = vmul.f32 0.03125, %v1135_v17 }
 0x67c   : > { %v1137_v19 = vadd.f32 1e-05, %v1136_v18 }
 0x67e   : > { %1550 = vrsqrt.f32 %v1137_v19 }
 0x68b   : > { %v1551_v20 = vpop.eup %1550 }
 0x68c   : > { %v1139_v22 = vmul.f32 %v1551_v20, %v1131_v14 }
 0x68e   : > { %v1147_v24 = vmul.f32 %v1386_v21, %v1139_v22 }
 0x690   : > { %v1155_v25 = vadd.f32 %v1387_v23, %v1147_v24 }
 0x692   : > { %1156 = vst.msk [vmem:[%s631_s3] sm:$0xff] %vm785_vm3, %v1155_v25 }
 0x693 PF: > { %s2028_s19 = sld [smem:[#allocation9_spill]]  ;;  %s1172_s16 = sshll.u32 %s631_s3, 4  ;;  %s1173_s16 = int_to_ptr.vmem [resolvable:$true] %s1172_s16 }
 0x694   : > { %s2029_s28 = sld [smem:[#allocation7_spill]]  ;;  %s1552_s29 = scalar_lea.vmem %s1173_s16, 128 }
 0x695   : > { %s2031_s0 = sld [smem:[#allocation23_spill]]  ;;  %p1553_p2 = scmp.ne.s32.totalorder %s1173_s16, %s1552_s29 }
 0x696   : > { %s1650_s15 = smov [#allocation3]  }
 0x697   : > { %p1554_p4 = pnand %p1553_p2, %p1780_p3  ;;  %s1556_s2 = sshll.u32 %s1650_s15, 4  ;;  %s1557_s2 = int_to_ptr.vmem [resolvable:$false] %s1556_s2 }
 0x698   : > { %s1558_s27 = scalar_lea.vmem %s1557_s2, 256  ;;  %p1559_p6 = scmp.lt.s32.totalorder %s1173_s16, %s1557_s2 }
 0x699   : > { %s1389_s24 = sshll.u32 %s2028_s19, 7  ;;  %p1555_p5 = pneg %p1554_p4 }
 0x69a   : > { %s2032_s20 = sand.u32 1, %s2029_s28   ;;  %p1560_p7 = scmp.lt.s32.totalorder %s1558_s27, %s1552_s29 }
 0x69b   : > { %s1170_s4 = scalar_lea.hbm %s2031_s0, %s1389_s24  ;;  %s1158_s30 = scalar_lea.sflag [#allocation4], %s2032_s20 }
 0x69c   : > { %p1561_p8 = por %p1560_p7, %p1559_p6 }
 0x69e   : > { %p1562_p10 = pnand %p1561_p8, %p1555_p5 }
 0x6a0   : > { %1565 = shalt.err (!%p1562_p10)
}
 0x6a1   : > { %s1566_s18 = scalar_lea.hbm %s1170_s4, 128  ;;  %s1570_s21 = scalar_lea.hbm %s2031_s0, 256 }
 0x6a2   : > { %p1567_p11 = scmp.ne.s32.totalorder %s1170_s4, %s1566_s18  ;;  %p1571_p0 = scmp.lt.s32.totalorder %s1170_s4, %s2031_s0 }
 0x6a3   : > { %p1572_p1 = scmp.lt.s32.totalorder %s1570_s21, %s1566_s18 }
 0x6a4   : > { %p1568_p12 = pnand %p1567_p11, %p1780_p3 }
 0x6a5   : > { %p1573_p2 = por %p1572_p1, %p1571_p0 }
 0x6a6   : > { %p1569_p13 = pneg %p1568_p12 }
 0x6a8   : > { %p1574_p4 = pnand %p1573_p2, %p1569_p13 }
 0x6aa   : > { %1577 = shalt.err (!%p1574_p4)
}
 0x6ab   : > { %1463 = dma.vmem_to_hbm [thread:$0]  (%p1780_p3), %s1173_s16, 128, %s1170_s4, %s1158_s30  }
 0x6ac PF: > { %s2033_s19 = sld [smem:[#allocation12_spill]] }
 0x6ad   : > { %s2034_s28 = sld [smem:[#allocation6_spill]] }
 0x6b2   : > { %p1469_p5 = scmp.ge.s32.totalorder %s2033_s19, 2 }
 0x6b3   : > { %s1184_s25 = sand.u32 1, %s2034_s28  }
 0x6b4   : > { %p1466_p6 = pnand %p1469_p5, %p1790_p9  ;;  %s1185_s1 = scalar_lea.sflag [#allocation4], %s1184_s25 }
 0x6b6   : > { %p1467_p7 = pneg %p1466_p6 }
 0x6b8   : > { %1611 = dma.done.wait (%p1467_p7), %s1185_s1, 128  }
 0x6b9   : > { %1613 = vsyncadd (%p1467_p7), %s1185_s1, 4294967168  ;;  %s28_s25 = sadd.s32 1, %s2033_s19   ;;  %s2036_s18 = sld [smem:[#allocation7_spill]] }
 0x6ba   : > { %p25_p8 = scmp.ge.s32.totalorder %s28_s25, 10   ;;  %s2037_s19 = sld [smem:[#allocation8_spill]] }
 0x6bb   : > { %s2038_s20 = sld [smem:[#allocation17_spill]] }
 0x6bc   : > { %s2039_s21 = sld [smem:[#allocation10_spill]]  ;;  %27 = sbr.rel (!%p25_p8) target bundleno = 12 (0xc), region = 150 }
 0x6bd   : > { %s2040_s22 = sld [smem:[#allocation11_spill]] }
 0x6be   : > { %s2041_s23 = sld [smem:[#allocation13_spill]] }
 0x6bf   : > { %s2042_s24 = sld [smem:[#allocation15_spill]] }
 0x6c1   :  { %1190 = vsyncpa [#allocation4], 1 }
 0x6c2   :  { %1192 = vsyncpa [#allocation4 + $0x1], 1 }

</bundles_post_ra>
